<compile_context>
chip_gen: v6e
topology: v6e:2x2x1
jax: 0.10.0
libtpu: 0.0.40
codegen_flags: <defaults>
</compile_context>

<pallas_src>
import functools

import jax
import jax.numpy as jnp
from jax.experimental import pallas as pl
from jax.experimental.pallas import tpu as pltpu


# Widest lane-dense last dim that divides the element count (only used so
# multi-chunk DMA splits are even; DMA correctness does not require it).
_LANE_CANDIDATES = (16384, 8192, 4096, 2048, 1024, 512, 256, 128)
# Only split into multiple DMAs when each chunk moves at least this much.
_MIN_BYTES_PER_CHUNK = 4 * 1024 * 1024


def _lane_dense_2d(total_elems: int):
    for lane in _LANE_CANDIDATES:
        if total_elems % lane == 0:
            return total_elems // lane, lane
    return None


def _dma_copy_whole_kernel(x_hbm, o_hbm, sem):
    # Single HBM->HBM DMA of the full array.
    cp = pltpu.make_async_copy(x_hbm, o_hbm, sem)
    cp.start()
    cp.wait()


@jax.jit
def _dma_copy_whole(x: jax.Array) -> jax.Array:
    return pl.pallas_call(
        _dma_copy_whole_kernel,
        out_shape=jax.ShapeDtypeStruct(x.shape, x.dtype),
        in_specs=[pl.BlockSpec(memory_space=pl.ANY)],
        out_specs=pl.BlockSpec(memory_space=pl.ANY),
        scratch_shapes=[pltpu.SemaphoreType.DMA(())],
    )(x)


def _dma_copy_2d_kernel(x_hbm, o_hbm, sems, *, num_chunks, chunk_rows):
    # Issue all chunk DMAs up front, then wait on all of them so the copies
    # overlap (each chunk is a contiguous row-range of the lane-dense slab).
    copies = []
    for c in range(num_chunks):
        rows = pl.ds(c * chunk_rows, chunk_rows)
        cp = pltpu.make_async_copy(x_hbm.at[rows, :], o_hbm.at[rows, :], sems.at[c])
        cp.start()
        copies.append(cp)
    for cp in copies:
        cp.wait()


@functools.partial(jax.jit, static_argnames=("num_chunks",))
def _dma_copy_2d(x2d: jax.Array, *, num_chunks: int) -> jax.Array:
    rows, lane = x2d.shape
    kernel = functools.partial(
        _dma_copy_2d_kernel, num_chunks=num_chunks, chunk_rows=rows // num_chunks
    )
    return pl.pallas_call(
        kernel,
        out_shape=jax.ShapeDtypeStruct((rows, lane), x2d.dtype),
        in_specs=[pl.BlockSpec(memory_space=pl.ANY)],
        out_specs=pl.BlockSpec(memory_space=pl.ANY),
        scratch_shapes=[pltpu.SemaphoreType.DMA((num_chunks,))],
    )(x2d)


def identity_map(x: jax.Array, *args, materialize: bool = False, **kwargs) -> jax.Array:
    """Pallas implementation of IdentityMap.forward(x) -> x.

    Default: zero-cost pass-through (no kernel, no HBM traffic).
    materialize=True: fresh buffer produced by direct HBM->HBM DMA(s).
    """
    if not materialize:
        return x

    # Decide whether to split the copy into multiple concurrent DMAs.
    num_chunks = 1
    layout = _lane_dense_2d(x.size)
    if layout is not None:
        rows, _ = layout
        nbytes = x.size * x.dtype.itemsize
        for cand in (4, 2):
            if rows % cand == 0 and nbytes // cand >= _MIN_BYTES_PER_CHUNK:
                num_chunks = cand
                break

    if num_chunks == 1:
        return _dma_copy_whole(x)

    rows, lane = layout
    y2d = _dma_copy_2d(x.reshape(rows, lane), num_chunks=num_chunks)
    return y2d.reshape(x.shape)


def identity_map_config():
    # Mirror of the `config` property on the PyTorch module.
    return {"mm_projector_type": "identity"}


if __name__ == "__main__":
    key = jax.random.PRNGKey(0)

    # Projector-style input: batch=2, seq=8, hidden=32.
    x = jax.random.normal(key, (2, 8, 32), dtype=jnp.float32)
    y_fast = identity_map(x)                    # zero-cost identity (hot path)
    y_copy = identity_map(x, materialize=True)  # single whole-ref HBM->HBM DMA

    # Non-128-divisible element count -> whole-ref DMA fallback path.
    x_odd = jax.random.normal(jax.random.PRNGKey(1), (2, 7, 9), dtype=jnp.float32)
    y_odd = identity_map(x_odd, materialize=True)

    # LLaVA-scale slab (batch=8, 576 vision tokens, hidden=1024, bf16 ~9 MiB)
    # -> exercises the multi-chunk concurrent-DMA path.
    x_big = jax.random.normal(jax.random.PRNGKey(2), (8, 576, 1024)).astype(jnp.bfloat16)
    y_big = identity_map(x_big, materialize=True)

    jax.block_until_ready((y_fast, y_copy, y_odd, y_big))

    assert y_fast.shape == x.shape and y_fast.dtype == x.dtype
    assert y_copy.shape == x.shape and y_copy.dtype == x.dtype
    assert y_odd.shape == x_odd.shape and y_odd.dtype == x_odd.dtype
    assert y_big.shape == x_big.shape and y_big.dtype == x_big.dtype
    assert bool(jnp.array_equal(y_fast, x))
    assert bool(jnp.array_equal(y_copy, x))
    assert bool(jnp.array_equal(y_odd, x_odd))
    assert bool(jnp.array_equal(y_big, x_big))
    assert identity_map_config() == {"mm_projector_type": "identity"}

    print("KERNEL_OK")
</pallas_src>

<mosaic_0001>
module attributes {stable_mosaic.version = 11 : i64} {
  func.func @_dma_copy_whole_kernel(%arg0: memref<2x8x32xf32, #tpu.memory_space<any>>, %arg1: memref<2x8x32xf32, #tpu.memory_space<any>>, %arg2: memref<!tpu.dma_semaphore, #tpu.memory_space<semaphore_mem>>) attributes {dimension_semantics = [], scalar_prefetch = 0 : i64, scratch_operands = 1 : i64, tpu.core_type = #tpu.core_type<tc>} {
    tpu.enqueue_dma source(%arg0 : memref<2x8x32xf32, #tpu.memory_space<any>>) target(%arg1 : memref<2x8x32xf32, #tpu.memory_space<any>>) target_semaphore(%arg2 : memref<!tpu.dma_semaphore, #tpu.memory_space<semaphore_mem>>)
    tpu.wait_dma2 semaphore(%arg2 : memref<!tpu.dma_semaphore, #tpu.memory_space<semaphore_mem>>) src(%arg0 : memref<2x8x32xf32, #tpu.memory_space<any>>) dst(%arg1 : memref<2x8x32xf32, #tpu.memory_space<any>>)
    return
  }
}

</mosaic_0001>

<bundles_post_ra>
// kernel: _dma_copy_whole.1
= control target key start
LH: loop header
LB: loop body
LE: loop exit
PB: predicated region body
PF: predicated region fallthrough
CT: control target
= control target key end

     0   :  { %s29_s6 = smov [#allocation2]   ;;  %s30_s7 = smov 131072   ;;  %s48_s0 = inlined_call_operand.hbm [shape: f32[2,8,32], index: 0, kind: input, shape index: {}]   ;;  %s49_s1 = inlined_call_operand.hbm [shape: f32[2,8,32], index: 1, kind: output, shape index: {}]  }
   0x1   :  { %s31_s8 = smov 0  }
   0x2   :  { %12 = dma.general %s48_s0, 256, %s49_s1, %s29_s6, %s30_s7, [#allocation4], %s31_s8, 0  }
   0x3   :  { %27 = dma.done.wait [#allocation2], 256 }
   0x4   :  { %28 = vsyncadd [#allocation2], 4294967040 }
   0x5   :  { %17 = vsyncmov [#allocation2] }
   0x8   :  { %s18_s13 = vpop.sfrf %17 }
   0x9   :  { %p23_p0 = scmp.ne.s32.totalorder %s18_s13, 0 }
   0xb   :  { %22 = shalt.err (%p23_p0)  }

</bundles_post_ra>
